<compile_context>
chip_gen: v5e
topology: v5e:2x2
jax: 0.10.0
libtpu: 0.0.40
codegen_flags: <defaults>
</compile_context>

<pallas_src>
import functools
import types

import jax
import jax.numpy as jnp
from jax.experimental import pallas as pl
from jax.experimental.pallas import tpu as pltpu

_LANE = 128
_SUBLANE = 8
_TARGET_BLOCK_BYTES = 2 * 1024 * 1024   # per-input block (2 MiB -> 4096 f32 rows)
_VMEM_LIMIT_BYTES = 32 * 1024 * 1024    # 2 inputs x 2 buffers x 2 MiB << 32 MiB


def _round_up(x, m):
    return (x + m - 1) // m * m


def _loss_reduce_kernel(rec_ref, img_ref, sum_out, max_out, *, rows, block_r):
    """Accumulate sum((rec-img)^2) and max(img) into (8, 128) output partials.

    Grid is 1-D over row-blocks of a lane-dense (rows, 128) slab.  The output
    blocks are resident across the whole (arbitrary) grid axis: init at step 0,
    accumulate every step, written back once at the end.
    """
    i = pl.program_id(0)

    @pl.when(i == 0)
    def _init():
        sum_out[...] = jnp.zeros_like(sum_out)
        max_out[...] = jnp.full_like(max_out, -jnp.inf)

    rec = rec_ref[...].astype(jnp.float32)
    img = img_ref[...].astype(jnp.float32)
    diff = rec - img
    sq = diff * diff

    if rows % block_r != 0:
        # Only the final (partial) block actually masks anything; the compare
        # + selects are pure VALU work hidden under the HBM-bound stream.
        row_idx = i * block_r + jax.lax.broadcasted_iota(
            jnp.int32, (block_r, _LANE), 0)
        valid = row_idx < rows
        sq = jnp.where(valid, sq, 0.0)
        img = jnp.where(valid, img, -jnp.inf)

    # Layout-preserving reshape (each (8,128) slice is exactly one f32 vreg
    # tile); reducing over the leading axis is plain elementwise VALU work.
    sq3 = sq.reshape(block_r // _SUBLANE, _SUBLANE, _LANE)
    img3 = img.reshape(block_r // _SUBLANE, _SUBLANE, _LANE)
    sum_out[...] = sum_out[...] + jnp.sum(sq3, axis=0)
    max_out[...] = jnp.maximum(max_out[...], jnp.max(img3, axis=0))


def _reduce_sumsq_and_max(rec2d, img2d):
    """rec2d / img2d: (rows, 128) arrays (any float dtype), rows >= 8.

    Returns (sum_part, max_part), each a (8, 128) float32 lane/sublane partial
    for (sum of squared error, max of img)."""
    rows = rec2d.shape[0]
    itemsize = max(rec2d.dtype.itemsize, img2d.dtype.itemsize)

    target_rows = max(_SUBLANE, _TARGET_BLOCK_BYTES // (_LANE * itemsize))
    target_rows = _round_up(target_rows, _SUBLANE)
    rows_down = (rows // _SUBLANE) * _SUBLANE          # >= 8 by precondition
    block_r = min(target_rows, rows_down)              # multiple of 8, <= rows
    steps = pl.cdiv(rows, block_r)

    kernel = functools.partial(_loss_reduce_kernel, rows=rows, block_r=block_r)

    bytes_accessed = int(rec2d.size) * rec2d.dtype.itemsize \
        + int(img2d.size) * img2d.dtype.itemsize \
        + 2 * _SUBLANE * _LANE * 4

    return pl.pallas_call(
        kernel,
        out_shape=(
            jax.ShapeDtypeStruct((_SUBLANE, _LANE), jnp.float32),
            jax.ShapeDtypeStruct((_SUBLANE, _LANE), jnp.float32),
        ),
        grid_spec=pltpu.PrefetchScalarGridSpec(
            num_scalar_prefetch=0,
            grid=(steps,),
            in_specs=[
                pl.BlockSpec((block_r, _LANE), lambda i: (i, 0)),
                pl.BlockSpec((block_r, _LANE), lambda i: (i, 0)),
            ],
            out_specs=[
                pl.BlockSpec((_SUBLANE, _LANE), lambda i: (0, 0)),
                pl.BlockSpec((_SUBLANE, _LANE), lambda i: (0, 0)),
            ],
        ),
        compiler_params=pltpu.CompilerParams(
            dimension_semantics=("arbitrary",),   # reduction axis, resident output
            vmem_limit_bytes=_VMEM_LIMIT_BYTES,
        ),
        cost_estimate=pl.CostEstimate(
            flops=5 * rows * _LANE,
            transcendentals=0,
            bytes_accessed=bytes_accessed,
        ),
    )(rec2d, img2d)


def djsccn_loss(args, rec, img):
    """JAX/Pallas equivalent of DJSCCNLoss.forward.

    rec, img: float arrays of identical shape (e.g. NCHW).
    args: object with attribute `rec_coeff`.
    Returns a dict of scalar float32 values mirroring the PyTorch module.
    """
    assert rec.shape == img.shape, "rec and img must have the same shape"
    numel = int(rec.size)
    assert numel > 0

    rec_flat = rec.reshape(-1)
    img_flat = img.reshape(-1)

    rows = numel // _LANE
    main_elems = rows * _LANE if rows >= _SUBLANE else 0

    sum_sq = jnp.float32(0.0)
    max_v = jnp.float32(-jnp.inf)

    # Tail (< 8*128 + 127 elements): plain JAX on a tiny slice.
    if main_elems < numel:
        tail_rec = rec_flat[main_elems:].astype(jnp.float32)
        tail_img = img_flat[main_elems:].astype(jnp.float32)
        td = tail_rec - tail_img
        sum_sq = sum_sq + jnp.sum(td * td)
        max_v = jnp.maximum(max_v, jnp.max(tail_img))

    # Main slab: zero-copy reshape when numel is a multiple of 128.
    if main_elems > 0:
        if main_elems == numel:
            rec2d = rec_flat.reshape(rows, _LANE)
            img2d = img_flat.reshape(rows, _LANE)
        else:
            # TODO(synk): this prefix slice may materialize a copy; a fully
            # copy-free ragged path would need 1-D / BoundedSlice blocking.
            rec2d = rec_flat[:main_elems].reshape(rows, _LANE)
            img2d = img_flat[:main_elems].reshape(rows, _LANE)
        sum_part, max_part = _reduce_sumsq_and_max(rec2d, img2d)
        sum_sq = sum_sq + jnp.sum(sum_part)     # collapse (8, 128) partial
        max_v = jnp.maximum(max_v, jnp.max(max_part))

    rec_loss = sum_sq / jnp.float32(numel)       # == nn.MSELoss()(rec, img)
    # Note: rec == img gives psnr = inf, matching the PyTorch reference.
    psnr_val = 20.0 * jnp.log10(max_v / jnp.sqrt(rec_loss))
    total_loss = jnp.float32(args.rec_coeff) * rec_loss

    zero = jnp.float32(0.0)
    return {
        "cls_loss": zero,
        "rec_loss": rec_loss,
        "psnr_loss": psnr_val,
        "kld_loss": zero,
        "inv_loss": zero,
        "var_loss": zero,
        "irep_loss": zero,
        "total_loss": total_loss,
    }


if __name__ == "__main__":
    args = types.SimpleNamespace(rec_coeff=1.0)
    key = jax.random.PRNGKey(0)
    k_rec, k_img, k2_rec, k2_img = jax.random.split(key, 4)

    # Case 1: small NCHW input, element count a multiple of 128 (zero-copy path).
    shape = (2, 4, 16, 16)  # batch=2, channels=4, spatial=16x16 -> 2048 elems
    img = jax.random.uniform(k_img, shape, dtype=jnp.float32)
    rec = img + 0.05 * jax.random.normal(k_rec, shape, dtype=jnp.float32)

    out = djsccn_loss(args, rec, img)
    jax.block_until_ready(out)

    ref_mse = jnp.mean((rec - img) ** 2)
    ref_psnr = 20.0 * jnp.log10(jnp.max(img) / jnp.sqrt(ref_mse))
    assert jnp.allclose(out["rec_loss"], ref_mse, rtol=1e-5, atol=1e-6)
    assert jnp.allclose(out["psnr_loss"], ref_psnr, rtol=1e-5, atol=1e-5)
    assert jnp.allclose(out["total_loss"], args.rec_coeff * ref_mse, rtol=1e-5, atol=1e-6)

    # Case 2: element count NOT a multiple of 128 (exercises mask + jnp tail path).
    shape2 = (2, 3, 15, 15)  # 1350 elems
    img2 = jax.random.uniform(k2_img, shape2, dtype=jnp.float32)
    rec2 = img2 + 0.05 * jax.random.normal(k2_rec, shape2, dtype=jnp.float32)

    out2 = djsccn_loss(args, rec2, img2)
    jax.block_until_ready(out2)

    ref_mse2 = jnp.mean((rec2 - img2) ** 2)
    ref_psnr2 = 20.0 * jnp.log10(jnp.max(img2) / jnp.sqrt(ref_mse2))
    assert jnp.allclose(out2["rec_loss"], ref_mse2, rtol=1e-5, atol=1e-6)
    assert jnp.allclose(out2["psnr_loss"], ref_psnr2, rtol=1e-5, atol=1e-5)

    # Case 3: bf16 inputs stream in native dtype (in-kernel upcast).
    img3 = jax.random.uniform(k_img, shape, dtype=jnp.bfloat16)
    rec3 = (img3.astype(jnp.float32)
            + 0.05 * jax.random.normal(k_rec, shape, dtype=jnp.float32)
            ).astype(jnp.bfloat16)
    out3 = djsccn_loss(args, rec3, img3)
    jax.block_until_ready(out3)
    ref_mse3 = jnp.mean((rec3.astype(jnp.float32) - img3.astype(jnp.float32)) ** 2)
    assert jnp.allclose(out3["rec_loss"], ref_mse3, rtol=1e-3, atol=1e-5)

    print("KERNEL_OK")
</pallas_src>

<mosaic_0001>
module attributes {stable_mosaic.version = 11 : i64} {
  func.func @_loss_reduce_kernel(%arg0: i32, %arg1: memref<16x128xf32, #tpu.memory_space<vmem>>, %arg2: memref<16x128xf32, #tpu.memory_space<vmem>>, %arg3: memref<8x128xf32, #tpu.memory_space<vmem>>, %arg4: memref<8x128xf32, #tpu.memory_space<vmem>>) attributes {dimension_semantics = [#tpu.dimension_semantics<arbitrary>], iteration_bounds = array<i64: 1>, scalar_prefetch = 0 : i64, scratch_operands = 0 : i64, tpu.core_type = #tpu.core_type<tc>, window_params = [{transform_indices = @transform_0, window_bounds = array<i64: 16, 128>}, {transform_indices = @transform_1, window_bounds = array<i64: 16, 128>}, {pipeline_mode = #tpu.pipeline_mode<synchronous>, transform_indices = @transform_2, window_bounds = array<i64: 8, 128>}, {pipeline_mode = #tpu.pipeline_mode<synchronous>, transform_indices = @transform_3, window_bounds = array<i64: 8, 128>}]} {
    %c0_i32 = arith.constant 0 : i32
    %0 = arith.cmpi eq, %arg0, %c0_i32 : i32
    %1 = arith.extui %0 : i1 to i32
    %c0_i32_0 = arith.constant 0 : i32
    %2 = arith.cmpi ne, %1, %c0_i32_0 : i32
    scf.if %2 {
      %cst_13 = arith.constant 0.000000e+00 : f32
      %17 = vector.broadcast %cst_13 : f32 to vector<8x128xf32>
      %c0_14 = arith.constant 0 : index
      %c0_15 = arith.constant 0 : index
      %18 = vector.load %arg3[%c0_14, %c0_15] : memref<8x128xf32, #tpu.memory_space<vmem>>, vector<8x128xf32>
      tpu.vector_store %arg3[%c0_14, %c0_15], %17 {strides = array<i32>} : memref<8x128xf32, #tpu.memory_space<vmem>>, vector<8x128xf32>,
      %cst_16 = arith.constant 0xFF800000 : f32
      %19 = vector.broadcast %cst_16 : f32 to vector<8x128xf32>
      %c0_17 = arith.constant 0 : index
      %c0_18 = arith.constant 0 : index
      %20 = vector.load %arg4[%c0_17, %c0_18] : memref<8x128xf32, #tpu.memory_space<vmem>>, vector<8x128xf32>
      tpu.vector_store %arg4[%c0_17, %c0_18], %19 {strides = array<i32>} : memref<8x128xf32, #tpu.memory_space<vmem>>, vector<8x128xf32>,
    } else {
    }
    %c0 = arith.constant 0 : index
    %c0_1 = arith.constant 0 : index
    %3 = vector.load %arg1[%c0, %c0_1] : memref<16x128xf32, #tpu.memory_space<vmem>>, vector<16x128xf32>
    %c0_2 = arith.constant 0 : index
    %c0_3 = arith.constant 0 : index
    %4 = vector.load %arg2[%c0_2, %c0_3] : memref<16x128xf32, #tpu.memory_space<vmem>>, vector<16x128xf32>
    %5 = arith.subf %3, %4 : vector<16x128xf32>
    %6 = arith.mulf %5, %5 : vector<16x128xf32>
    %7 = vector.shape_cast %6 : vector<16x128xf32> to vector<2x8x128xf32>
    %8 = vector.shape_cast %4 : vector<16x128xf32> to vector<2x8x128xf32>
    %c0_4 = arith.constant 0 : index
    %c0_5 = arith.constant 0 : index
    %9 = vector.load %arg3[%c0_4, %c0_5] : memref<8x128xf32, #tpu.memory_space<vmem>>, vector<8x128xf32>
    %cst = arith.constant dense<0.000000e+00> : vector<8x128xf32>
    %10 = vector.multi_reduction <add>, %7, %cst [0] : vector<2x8x128xf32> to vector<8x128xf32>
    %11 = arith.addf %9, %10 : vector<8x128xf32>
    %c0_6 = arith.constant 0 : index
    %c0_7 = arith.constant 0 : index
    %12 = vector.load %arg3[%c0_6, %c0_7] : memref<8x128xf32, #tpu.memory_space<vmem>>, vector<8x128xf32>
    tpu.vector_store %arg3[%c0_6, %c0_7], %11 {strides = array<i32>} : memref<8x128xf32, #tpu.memory_space<vmem>>, vector<8x128xf32>,
    %c0_8 = arith.constant 0 : index
    %c0_9 = arith.constant 0 : index
    %13 = vector.load %arg4[%c0_8, %c0_9] : memref<8x128xf32, #tpu.memory_space<vmem>>, vector<8x128xf32>
    %cst_10 = arith.constant dense<0xFF800000> : vector<8x128xf32>
    %14 = vector.multi_reduction <maximumf>, %8, %cst_10 [0] : vector<2x8x128xf32> to vector<8x128xf32>
    %15 = arith.maximumf %13, %14 : vector<8x128xf32>
    %c0_11 = arith.constant 0 : index
    %c0_12 = arith.constant 0 : index
    %16 = vector.load %arg4[%c0_11, %c0_12] : memref<8x128xf32, #tpu.memory_space<vmem>>, vector<8x128xf32>
    tpu.vector_store %arg4[%c0_11, %c0_12], %15 {strides = array<i32>} : memref<8x128xf32, #tpu.memory_space<vmem>>, vector<8x128xf32>,
    return
  }
  func.func @transform_0(%arg0: i32) -> (i32, i32) {
    %c0_i32 = arith.constant 0 : i32
    %c0_i32_0 = arith.constant 0 : i32
    return %arg0, %c0_i32 : i32, i32
  }
  func.func @transform_1(%arg0: i32) -> (i32, i32) {
    %c0_i32 = arith.constant 0 : i32
    %c0_i32_0 = arith.constant 0 : i32
    return %arg0, %c0_i32 : i32, i32
  }
  func.func @transform_2(%arg0: i32) -> (i32, i32) {
    %c0_i32 = arith.constant 0 : i32
    %c0_i32_0 = arith.constant 0 : i32
    %c0_i32_1 = arith.constant 0 : i32
    return %c0_i32, %c0_i32_0 : i32, i32
  }
  func.func @transform_3(%arg0: i32) -> (i32, i32) {
    %c0_i32 = arith.constant 0 : i32
    %c0_i32_0 = arith.constant 0 : i32
    %c0_i32_1 = arith.constant 0 : i32
    return %c0_i32, %c0_i32_0 : i32, i32
  }
}

</mosaic_0001>

<bundles_post_ra>
// kernel: tpu_custom_call.1
= control target key start
LH: loop header
LB: loop body
LE: loop exit
PB: predicated region body
PF: predicated region fallthrough
CT: control target
= control target key end

     0   :  { %9 = vsyncpa [#allocation3], 0  ;;  %s253_s0 = inlined_call_operand.hbm [shape: f32[16,128], index: 0, kind: input, shape index: {}]   ;;  %s254_s1 = inlined_call_operand.hbm [shape: f32[16,128], index: 1, kind: input, shape index: {}]   ;;  %s255_s2 = inlined_call_operand.hbm [shape: f32[8,128], index: 2, kind: output, shape index: {0}]   ;;  %s256_s3 = inlined_call_operand.hbm [shape: f32[8,128], index: 3, kind: output, shape index: {1}]  }
   0x1   :  { %10 = vsyncpa [#allocation6], 0 }
   0x2   :  { %11 = vsyncpa [#allocation4], 0 }
   0x3   :  { %12 = vsyncpa [#allocation9], 0  ;;  %s17_s14 = sshll.u32 %s253_s0, 4  ;;  %s215_s15 = smov [#allocation2]   ;;  %s18_s14 = int_to_ptr.hbm [resolvable:$true] %s17_s14 }
   0x4   :  { %s19_s16 = sshll.u32 %s215_s15, 4  ;;  %s30_s19 = sshll.u32 %s254_s1, 4  ;;  %s20_s16 = int_to_ptr.vmem [resolvable:$true] %s19_s16  ;;  %s31_s19 = int_to_ptr.hbm [resolvable:$true] %s30_s19 }
   0x5   :  { %s216_s20 = smov 128   ;;  %s217_s21 = smov 8  }
   0x6   :  { %25 = dma.hbm_to_vmem [thread:$0]  %s18_s14, 256, %s20_s16, [#allocation3], %s216_s20, %s216_s20, %s217_s21  }
   0x7   :  { %s218_s22 = smov [#allocation5]  }
   0x8   :  { %s32_s23 = sshll.u32 %s218_s22, 4  ;;  %s33_s23 = int_to_ptr.vmem [resolvable:$true] %s32_s23 }
   0x9   :  { %38 = dma.hbm_to_vmem [thread:$0]  %s31_s19, 256, %s33_s23, [#allocation6], %s216_s20, %s216_s20, %s217_s21  }
   0xa   :  { %207 = dma.done.wait [#allocation3], 256  }
   0xb   :  { %208 = vsyncadd [#allocation3], 4294967040 }
   0xc   :  { %209 = dma.done.wait [#allocation6], 256  }
   0xd   :  { %210 = vsyncadd [#allocation6], 4294967040  ;;  %v53_v0 = vld [vmem:[#allocation2] sm:$0xff]  ;;  %v54_v1 = vld [vmem:[#allocation2 + $0x8] sm:$0xff]  ;;  %s219_s0 = smov [#allocation8]   ;;  %s87_s26 = sshll.u32 %s256_s3, 4  ;;  %s88_s26 = int_to_ptr.hbm [resolvable:$true] %s87_s26 }
   0xe   :  { %v55_v2 = vld [vmem:[#allocation5] sm:$0xff]  ;;  %v56_v3 = vld [vmem:[#allocation5 + $0x8] sm:$0xff]  ;;  %s85_s24 = sshll.u32 %s219_s0, 4  ;;  %s220_s27 = smov [#allocation7]   ;;  %s86_s24 = int_to_ptr.vmem [resolvable:$true] %s85_s24 }
   0xf   :  { %v57_v4 = vsub.f32 %v53_v0, %v55_v2  ;;  %v58_v5 = vsub.f32 %v54_v1, %v56_v3  ;;  %v66_v6 = vmax.f32 %v55_v2, %v56_v3  ;;  %s74_s28 = sshll.u32 %s220_s27, 4  ;;  %s76_s4 = sshll.u32 %s255_s2, 4  ;;  %s75_s28 = int_to_ptr.vmem [resolvable:$true] %s74_s28  ;;  %s77_s4 = int_to_ptr.hbm [resolvable:$true] %s76_s4 }
  0x11   :  { %v59_v7 = vmul.f32 %v57_v4, %v57_v4  ;;  %v60_v8 = vmul.f32 %v58_v5, %v58_v5  ;;  %68 = vst [vmem:[#allocation8] sm:$0xff] %v66_v6 }
  0x12   :  { %90 = dma.vmem_to_hbm [thread:$0]  %s86_s24, 128, %s88_s26, [#allocation9]  }
  0x13   :  { %v62_v9 = vadd.f32 %v60_v8, %v59_v7 }
  0x15   :  { %64 = vst [vmem:[#allocation7] sm:$0xff] %v62_v9 }
  0x16   :  { %79 = dma.vmem_to_hbm [thread:$0]  %s75_s28, 128, %s77_s4, [#allocation4]  }
  0x17   :  { %211 = dma.done.wait [#allocation4], 128  }
  0x18   :  { %212 = vsyncadd [#allocation4], 4294967168 }
  0x19   :  { %213 = dma.done.wait [#allocation9], 128  }
  0x1a   :  { %214 = vsyncadd [#allocation9], 4294967168 }
  0x1b   :  { %99 = vsyncpa [#allocation3], 1 }
  0x1c   :  { %100 = vsyncpa [#allocation6], 1 }
  0x1d   :  { %101 = vsyncpa [#allocation4], 1 }
  0x1e   :  { %102 = vsyncpa [#allocation9], 1 }

</bundles_post_ra>
